<compile_context>
chip_gen: v6e
topology: v6e:2x2x1
jax: 0.10.0
libtpu: 0.0.40
codegen_flags: <defaults>
</compile_context>

<pallas_src>
import jax
import jax.numpy as jnp
from jax.experimental import pallas as pl
from jax.experimental.pallas import tpu as pltpu


# ----------------------------------------------------------------------------
# Kernels
# ----------------------------------------------------------------------------

def _basenet_tiled_kernel(x_ref, o_ref):
    # Identity hot path: whole-tile vector load + store (VMEM only; BaseNet
    # has no parameters).  A concrete subclass would replace this body with
    # its real compute while keeping the same tiling / pipelining skeleton.
    o_ref[...] = x_ref[...]


def _basenet_dma_copy_kernel(x_hbm, o_hbm, sem):
    # Single HBM -> HBM DMA: skips the HBM->VMEM->vreg->VMEM->HBM round trip
    # entirely; only the unavoidable HBM read + write remains.
    cp = pltpu.make_async_copy(x_hbm, o_hbm, sem)
    cp.start()
    cp.wait()


# ----------------------------------------------------------------------------
# Helpers
# ----------------------------------------------------------------------------

def _round_up(a, b):
    return ((a + b - 1) // b) * b


def _vmem_capacity_bytes():
    try:
        return int(pltpu.get_tpu_info().vmem_capacity_bytes)
    except Exception:
        return 128 * 1024 * 1024  # conservative default (v5e/v6e)


def _default_block_bytes(vmem_cap):
    # v7x has only 64 MiB physical VMEM per TensorCore: keep blocks ~6 MiB so
    # 2x(in) + 2x(out) buffers plus Mosaic internal scratch fit comfortably.
    # v5e/v6e (128 MiB) can use larger blocks to amortize per-step overhead.
    if vmem_cap <= 64 * 1024 * 1024:
        return 6 * 1024 * 1024
    return 12 * 1024 * 1024


def _pick_tile(dim, granule, max_elems):
    """Tile length with waste bounded by one granule.

    Returns either the full extent (always a legal block dim) or a multiple of
    `granule` chosen so the number of blocks is the minimum needed to stay
    under `max_elems` per tile.
    """
    if dim <= max_elems:
        return dim
    max_elems = max(granule, (max_elems // granule) * granule)
    nblocks = -(-dim // max_elems)          # cdiv
    return _round_up(-(-dim // nblocks), granule)


# ----------------------------------------------------------------------------
# Forward wrapper
# ----------------------------------------------------------------------------

def basenet_forward(x, *, mode="identity", block_bytes=None):
    """Forward pass of the (parameter-free) BaseNet: y = x.

    mode:
      "identity" (default) — short-circuit, returns x with no device traffic.
      "copy_dma"           — single HBM->HBM DMA copy (on-device verification).
      "tiled"              — tiled VMEM-pipelined copy; the skeleton a concrete
                             subclass would fill with real compute.
    """
    if mode == "identity":
        # BaseNet applies no transformation; the optimal "kernel" is no kernel.
        return x

    if x.ndim != 2:
        # TODO(synk): kernel paths assume 2-D tabular input (N, D) as used by
        # the DeepSAD tabular baselines; other ranks fall back to identity.
        return x

    n, d = x.shape
    itemsize = jnp.dtype(x.dtype).itemsize
    cost = pl.CostEstimate(
        flops=0,
        transcendentals=0,
        bytes_accessed=2 * n * d * itemsize,   # real (unpadded) footprint
    )

    if mode == "copy_dma":
        return pl.pallas_call(
            _basenet_dma_copy_kernel,
            out_shape=jax.ShapeDtypeStruct((n, d), x.dtype),
            in_specs=[pl.BlockSpec(memory_space=pl.ANY)],
            out_specs=pl.BlockSpec(memory_space=pl.ANY),
            scratch_shapes=[pltpu.SemaphoreType.DMA],
            cost_estimate=cost,
        )(x)

    if mode != "tiled":
        raise ValueError(f"unknown mode: {mode}")

    # ---------------- tiled (subclass-compute skeleton) path ----------------
    vmem_cap = _vmem_capacity_bytes()
    if block_bytes is None:
        block_bytes = _default_block_bytes(vmem_cap)

    lane = 128
    # Packed-sublane granularity: 8 rows for 32-bit, 16 for 16-bit, 32 for 8-bit.
    sub = max(8, 32 // itemsize)

    # Feature (lane) tiling first: budget assuming at least `sub` rows.
    max_d = max(lane, block_bytes // (sub * itemsize))
    tile_d = _pick_tile(d, lane, max_d)

    # Row (sublane) tiling with the chosen feature tile.
    max_n = max(sub, block_bytes // (tile_d * itemsize))
    tile_n = _pick_tile(n, sub, max_n)

    # Guarantee >= 2 blocks along the (parallel) row axis when possible so
    # v7x's second TensorCore contributes a DMA stream (harmless elsewhere:
    # one extra ~0.35 us grid step).
    if pl.cdiv(n, tile_n) == 1 and pl.cdiv(d, tile_d) == 1 and n >= 2 * sub:
        tile_n = _round_up(pl.cdiv(n, 2), sub)

    grid = (pl.cdiv(n, tile_n), pl.cdiv(d, tile_d))

    # Double-buffered input + output blocks => ~4x block bytes live in VMEM,
    # plus headroom for Mosaic internal scratch; cap below physical capacity.
    tile_bytes = tile_n * tile_d * itemsize
    cap = 44 * 1024 * 1024 if vmem_cap <= 64 * 1024 * 1024 else 96 * 1024 * 1024
    vmem_limit = min(cap, max(16 * 1024 * 1024, 4 * tile_bytes + (4 << 20)))

    return pl.pallas_call(
        _basenet_tiled_kernel,
        out_shape=jax.ShapeDtypeStruct((n, d), x.dtype),
        grid=grid,
        in_specs=[pl.BlockSpec((tile_n, tile_d), lambda i, j: (i, j))],
        out_specs=pl.BlockSpec((tile_n, tile_d), lambda i, j: (i, j)),
        compiler_params=pltpu.CompilerParams(
            dimension_semantics=("parallel", "parallel"),
            vmem_limit_bytes=vmem_limit,
        ),
        cost_estimate=cost,
    )(x)


# ----------------------------------------------------------------------------
# Module mirror
# ----------------------------------------------------------------------------

class BaseNetPallas:
    """JAX/Pallas mirror of DeepSAD's BaseNet base class."""

    def __init__(self):
        self.rep_dim = None  # matches BaseNet.__init__ (no parameters)
        self.params = {}     # BaseNet declares no trainable parameters

    def forward(self, x, *, mode="identity"):
        return basenet_forward(x, mode=mode)

    def summary(self):
        # Trainable-parameter count (sum of prod(p.shape)); zero for BaseNet.
        n_params = sum(int(jnp.prod(jnp.array(p.shape)))
                       for p in self.params.values())
        print(f"Trainable parameters: {n_params}")


if __name__ == "__main__":
    key = jax.random.PRNGKey(0)
    k0, k1 = jax.random.split(key)

    net = BaseNetPallas()

    # Small tabular f32 input with non-aligned shape (exercises ragged edge
    # blocks — no pad/slice round trips in the wrapper).
    x_f32 = jax.random.normal(k0, (37, 300), dtype=jnp.float32)

    # Default path: identity short-circuit (no device traffic).
    y0 = jax.block_until_ready(net.forward(x_f32))
    assert y0.shape == x_f32.shape and y0.dtype == x_f32.dtype
    assert bool(jnp.array_equal(y0, x_f32))

    # Tiled skeleton path (ragged edge block along rows, full-extent lane dim).
    y1 = jax.block_until_ready(net.forward(x_f32, mode="tiled"))
    assert y1.shape == x_f32.shape and y1.dtype == x_f32.dtype
    assert bool(jnp.array_equal(y1, x_f32))

    # Single HBM->HBM DMA copy path.
    y2 = jax.block_until_ready(net.forward(x_f32, mode="copy_dma"))
    assert y2.shape == x_f32.shape and y2.dtype == x_f32.dtype
    assert bool(jnp.array_equal(y2, x_f32))

    # Small bf16 input (exercises dtype-aware 16-row sublane granularity and
    # the >=2-block row split).
    x_bf16 = jax.random.normal(k1, (64, 256), dtype=jnp.bfloat16)
    y3 = jax.block_until_ready(net.forward(x_bf16, mode="tiled"))
    assert y3.shape == x_bf16.shape and y3.dtype == x_bf16.dtype
    assert bool(jnp.array_equal(y3, x_bf16))

    net.summary()
    print("KERNEL_OK")
</pallas_src>

<mosaic_0001>
module attributes {stable_mosaic.version = 11 : i64} {
  func.func @_basenet_tiled_kernel(%arg0: i32, %arg1: i32, %arg2: memref<24x300xf32, #tpu.memory_space<vmem>>, %arg3: memref<24x300xf32, #tpu.memory_space<vmem>>) attributes {dimension_semantics = [#tpu.dimension_semantics<parallel>, #tpu.dimension_semantics<parallel>], iteration_bounds = array<i64: 2, 1>, scalar_prefetch = 0 : i64, scratch_operands = 0 : i64, tpu.core_type = #tpu.core_type<tc>, window_params = [{transform_indices = @transform_0, window_bounds = array<i64: 24, 300>}, {transform_indices = @transform_1, window_bounds = array<i64: 24, 300>}]} {
    %c0 = arith.constant 0 : index
    %c0_0 = arith.constant 0 : index
    %0 = vector.load %arg2[%c0, %c0_0] : memref<24x300xf32, #tpu.memory_space<vmem>>, vector<24x300xf32>
    %c0_1 = arith.constant 0 : index
    %c0_2 = arith.constant 0 : index
    %1 = vector.load %arg3[%c0_1, %c0_2] : memref<24x300xf32, #tpu.memory_space<vmem>>, vector<24x300xf32>
    tpu.vector_store %arg3[%c0_1, %c0_2], %0 {strides = array<i32>} : memref<24x300xf32, #tpu.memory_space<vmem>>, vector<24x300xf32>,
    return
  }
  func.func @transform_0(%arg0: i32, %arg1: i32) -> (i32, i32) {
    %c0_i32 = arith.constant 0 : i32
    return %arg0, %arg1 : i32, i32
  }
  func.func @transform_1(%arg0: i32, %arg1: i32) -> (i32, i32) {
    %c0_i32 = arith.constant 0 : i32
    return %arg0, %arg1 : i32, i32
  }
}

</mosaic_0001>

<bundles_post_ra>
// kernel: tpu_custom_call.1
= control target key start
LH: loop header
LB: loop body
LE: loop exit
PB: predicated region body
PF: predicated region fallthrough
CT: control target
= control target key end

     0   :  { %6 = vsyncpa [#allocation3], 0  ;;  %s701_s0 = inlined_call_operand.hbm [shape: f32[37,300], index: 0, kind: input, shape index: {}]   ;;  %s702_s1 = inlined_call_operand.hbm [shape: f32[37,300], index: 1, kind: output, shape index: {}]  }
   0x1   :  { %8 = vsyncpa [#allocation3 + $0x1], 0 }
   0x2   :  { %9 = vsyncpa [#allocation4], 0 }
   0x3   :  { %11 = vsyncpa [#allocation4 + $0x1], 0  ;;  %s511_s6 = smov 0   ;;  %s513_s7 = smov 0  }
   0x4   :  { %s515_s8 = smov 0   ;;  %s517_s9 = smov 0  }
   0x5   :  { %s519_s10 = smov 0   ;;  %s521_s11 = smov 0  }
   0x6 LB: > { %s305_s12 = sadd.s32 4294967295, %s493_s11   ;;  %s306_s13 = sadd.s32 4294967294, %s493_s11   ;;  %s493_s11 = sphi %s521_s11, %s17_s11   ;;  %s489_s10 = sphi %s519_s10, %s712_s10   ;;  %s485_s9 = sphi %s517_s9, %s711_s9   ;;  %s481_s8 = sphi %s515_s8, %s710_s8   ;;  %s477_s7 = sphi %s513_s7, %s709_s7   ;;  %s473_s6 = sphi %s511_s6, %s708_s6  }
   0x7   : > { %s29_s14 = sadd.s32 1, %s489_s10  ;;  %s38_s15 = sadd.s32 1, %s481_s8 }
   0x8   : > { %p31_p0 = scmp.ge.s32.totalorder %s29_s14, 2  ;;  %p45_p1 = scmp.ne.s32.totalorder %s481_s8, %s477_s7 }
   0x9   : > { %p46_p2 = scmp.eq.s32.totalorder %s493_s11, 0  ;;  %p51_p3 = scmp.ne.s32.totalorder %s477_s7, %s473_s6 }
   0xa   : > { %s714_s14 = smov (%p31_p0, %s29_s14), 0  ;;  %p52_p5 = scmp.eq.s32.totalorder %s305_s12, 0 }
   0xb   : > { %p47_p4 = por %p46_p2, %p45_p1  ;;  %s33_s16 = ssub.s32 %s489_s10, %s714_s14 }
   0xc   : > { %p77_p6 = scmp.eq.s32.totalorder %s305_s12, 1  ;;  %p36_p7 = scmp.eq.s32.totalorder %s33_s16, 0 }
   0xd   : > { %p554_p8 = por %p52_p5, %p51_p3  ;;  %p83_p10 = scmp.eq.s32.totalorder %s306_s13, 1 }
   0xe   : > { %p558_p9 = por %p77_p6, %p45_p1  ;;  %p703_p12 = scmp.ge.s32.totalorder %s493_s11, 2 }
   0xf   : > { %s563_s19 = scalar_select %p36_p7, %s481_s8, %s38_s15  }
  0x10   : > { %p565_p11 = por %p83_p10, %p51_p3  ;;  %99 = sbr.rel (%p703_p12) target bundleno = 56 (0x38), region = 16 }
  0x15   : > { %102 = sbr.rel (!%p47_p4) target bundleno = 56 (0x38), region = 20  ;;  %s103_s21 = sand.u32 (%p47_p4), 1, %s481_s8  }
  0x16   : > { %s108_s22 = smul.u32 (%p47_p4), 3, %s489_s10  ;;  %s577_s27 = scalar_lea.sflag (%p47_p4), [#allocation3], %s103_s21 }
  0x17   : > { %s322_s23 = smul.u32 (%p47_p4), 72, %s103_s21 }
  0x18   : > { %s110_s24 = ssub.s32 (%p47_p4), 5, %s108_s22 }
  0x19   : > { %p111_p13 = scmp.lt.s32.totalorder (%p47_p4), %s110_s24, 3  ;;  %s107_s28 = scalar_lea.vmem (%p47_p4), [#allocation2], %s322_s23 }
  0x1b   : > { %s716_s24 = smov (!%p111_p13, %s110_s24), 3 }
  0x1c   : > { %s574_s25 = smul.u32 384, %s716_s24 }
  0x1e   : > { %s116_s26 = ssub.s32 1152, %s574_s25 }
  0x1f   : > { %117 = vsyncadd %s577_s27, %s116_s26  ;;  %p311_p0 = scmp.ne.s32.totalorder %s574_s25, 0  ;;  %s332_s29 = smul.u32 1152, %s489_s10 }
  0x20   : > { %s124_s30 = sshll.u32 %s107_s28, 4  ;;  %s391_s15 = scalar_lea.hbm %s701_s0, 1920  ;;  %s587_s30 = int_to_ptr.vmem [resolvable:$true] %s124_s30 }
  0x21   : > { %s585_s4 = scalar_lea.hbm %s701_s0, %s332_s29 }
  0x22   : > { %s387_s5 = scalar_lea.hbm %s585_s4, %s574_s25 }
  0x23   : > { %p388_p1 = scmp.ne.s32.totalorder %s585_s4, %s387_s5  ;;  %p393_p4 = scmp.lt.s32.totalorder %s391_s15, %s387_s5 }
  0x25   : > { %p389_p2 = pnand %p388_p1, %p311_p0 }
  0x27   : > { %p390_p3 = pneg %p389_p2 }
  0x29   : > { %p395_p5 = pnand %p393_p4, %p390_p3 }
  0x2b   : > { %398 = shalt.err (!%p395_p5)
}
  0x2c   : > { %s399_s16 = scalar_lea.vmem %s587_s30, %s574_s25  ;;  %s495_s21 = smov [#allocation2]  }
  0x2d   : > { %p400_p6 = scmp.ne.s32.totalorder %s587_s30, %s399_s16  ;;  %s403_s22 = sshll.u32 %s495_s21, 4  ;;  %s404_s22 = int_to_ptr.vmem [resolvable:$false] %s403_s22 }
  0x2e   : > { %s405_s23 = scalar_lea.vmem %s404_s22, 2304  ;;  %p406_p13 = scmp.lt.s32.totalorder %s587_s30, %s404_s22 }
  0x2f   : > { %p401_p7 = pnand %p400_p6, %p311_p0  ;;  %p407_p1 = scmp.lt.s32.totalorder %s405_s23, %s399_s16 }
  0x31   : > { %p402_p10 = pneg %p401_p7  ;;  %p408_p2 = por %p407_p1, %p406_p13 }
  0x33   : > { %p409_p12 = pnand %p408_p2, %p402_p10 }
  0x35   : > { %412 = shalt.err (!%p409_p12)
}
  0x36   : > { %s496_s24 = smov 384   ;;  %s497_s26 = smov 24  }
  0x37   : > { %130 = dma.hbm_to_vmem [thread:$0]  (%p311_p0), %s585_s4, %s574_s25, %s587_s30, %s577_s27, %s496_s24, %s496_s24, %s497_s26  }
  0x38 PF: > { %p314_p3 = scmp.ge.s32.totalorder %s493_s11, 1  ;;  %p132_p4 = scmp.lt.s32.totalorder %s493_s11, 3 }
  0x3a   : > { %p133_p5 = pnand %p314_p3, %p132_p4 }
  0x3b   : > { %s612_s28 = sand.u32 (!%p133_p5), 1, %s477_s7  }
  0x3c   : > { %136 = sbr.rel (%p133_p5) target bundleno = 101 (0x65), region = 24  ;;  %s139_s2 = scalar_lea.sflag (!%p133_p5), [#allocation3], %s612_s28 }
  0x3d   : > { %s324_s29 = smul.u32 (!%p133_p5), 72, %s612_s28 }
  0x3f   : > { %s142_s3 = scalar_lea.vmem (!%p133_p5), [#allocation2], %s324_s29 }
  0x41   : > { %464 = dma.done.wait (%p554_p8), %s139_s2, 1152  }
  0x42   : > { %466 = vsyncadd (%p554_p8), %s139_s2, 4294966144  ;;  %vm186_vm0 = vcmask 359424   ;;  %v175_v0 = vld [vmem:[%s142_s3] sm:$0xff]  ;;  %v176_v1 = vld [vmem:[%s142_s3 + $0x8] sm:$0xff]  ;;  %s620_s25 = scalar_lea.vmem [#allocation5], %s324_s29  ;;  %s195_s17 = scalar_lea.sflag [#allocation4], %s612_s28 }
  0x43   : > { %v177_v2 = vld [vmem:[%s142_s3 + $0x10] sm:$0xff]  ;;  %184 = vst [vmem:[%s620_s25] sm:$0xff] %v175_v0  ;;  %185 = vst [vmem:[%s620_s25 + $0x8] sm:$0xff] %v176_v1  ;;  %v178_v3 = vld [vmem:[%s142_s3 + $0x18] sm:$0xff]  ;;  %201 = sbr.rel (!%p558_p9) target bundleno = 101 (0x65), region = 32 }
  0x44   : > { %187 = vst.msk [vmem:[%s620_s25 + $0x10] sm:$0xff] %vm186_vm0, %v177_v2  ;;  %v179_v4 = vld [vmem:[%s142_s3 + $0x20] sm:$0xff]  ;;  %v180_v5 = vld [vmem:[%s142_s3 + $0x28] sm:$0xff]  ;;  %188 = vst [vmem:[%s620_s25 + $0x18] sm:$0xff] %v178_v3  ;;  %s202_s27 = smul.u32 (%p558_p9), 3, %s485_s9 }
  0x45   : > { %189 = vst [vmem:[%s620_s25 + $0x20] sm:$0xff] %v179_v4  ;;  %190 = vst.msk [vmem:[%s620_s25 + $0x28] sm:$0xff] %vm186_vm0, %v180_v5  ;;  %v181_v6 = vld [vmem:[%s142_s3 + $0x30] sm:$0xff]  ;;  %v182_v7 = vld [vmem:[%s142_s3 + $0x38] sm:$0xff] }
  0x46   : > { %v183_v8 = vld [vmem:[%s142_s3 + $0x40] sm:$0xff]  ;;  %191 = vst [vmem:[%s620_s25 + $0x30] sm:$0xff] %v181_v6  ;;  %192 = vst [vmem:[%s620_s25 + $0x38] sm:$0xff] %v182_v7  ;;  %s204_s30 = ssub.s32 (%p558_p9), 5, %s202_s27 }
  0x47   : > { %193 = vst.msk [vmem:[%s620_s25 + $0x40] sm:$0xff] %vm186_vm0, %v183_v8  ;;  %p205_p8 = scmp.lt.s32.totalorder (%p558_p9), %s204_s30, 3 }
  0x49   : > { %s718_s30 = smov (!%p205_p8, %s204_s30), 3 }
  0x4a   : > { %s638_s4 = smul.u32 384, %s718_s30 }
  0x4c   : > { %s210_s5 = ssub.s32 1152, %s638_s4 }
  0x4d   : > { %211 = vsyncadd %s195_s17, %s210_s5  ;;  %p317_p12 = scmp.ne.s32.totalorder %s638_s4, 0  ;;  %s333_s18 = smul.u32 1152, %s485_s9 }
  0x4e   : > { %s218_s12 = sshll.u32 %s620_s25, 4  ;;  %s498_s22 = smov [#allocation5]   ;;  %s651_s12 = int_to_ptr.vmem [resolvable:$true] %s218_s12 }
  0x4f   : > { %s649_s16 = scalar_lea.hbm %s702_s1, %s333_s18  ;;  %s413_s21 = scalar_lea.vmem %s651_s12, %s638_s4 }
  0x50   : > { %p414_p9 = scmp.ne.s32.totalorder %s651_s12, %s413_s21  ;;  %s417_s23 = sshll.u32 %s498_s22, 4  ;;  %s418_s23 = int_to_ptr.vmem [resolvable:$false] %s417_s23 }
  0x51   : > { %s419_s9 = scalar_lea.vmem %s418_s23, 2304  ;;  %p420_p7 = scmp.lt.s32.totalorder %s651_s12, %s418_s23 }
  0x52   : > { %p415_p0 = pnand %p414_p9, %p317_p12  ;;  %p421_p10 = scmp.lt.s32.totalorder %s419_s9, %s413_s21 }
  0x54   : > { %p416_p6 = pneg %p415_p0  ;;  %p422_p13 = por %p421_p10, %p420_p7 }
  0x56   : > { %p423_p1 = pnand %p422_p13, %p416_p6 }
  0x58   : > { %426 = shalt.err (!%p423_p1)
}
  0x59   : > { %s427_s24 = scalar_lea.hbm %s649_s16, %s638_s4  ;;  %s431_s2 = scalar_lea.hbm %s702_s1, 1920 }
  0x5a   : > { %p428_p2 = scmp.ne.s32.totalorder %s649_s16, %s427_s24  ;;  %p432_p5 = scmp.lt.s32.totalorder %s649_s16, %s702_s1 }
  0x5b   : > { %p433_p8 = scmp.lt.s32.totalorder %s431_s2, %s427_s24 }
  0x5c   : > { %p429_p3 = pnand %p428_p2, %p317_p12 }
  0x5d   : > { %p434_p9 = por %p433_p8, %p432_p5 }
  0x5e   : > { %p430_p4 = pneg %p429_p3 }
  0x60   : > { %p435_p0 = pnand %p434_p9, %p430_p4 }
  0x62   : > { %438 = shalt.err (!%p435_p0)
}
  0x63   : > { %s499_s27 = smov 384   ;;  %s500_s30 = smov 24  }
  0x64   : > { %224 = dma.vmem_to_hbm [thread:$0]  (%p317_p12), %s651_s12, %s638_s4, %s649_s16, %s195_s17, %s499_s27, %s499_s27, %s500_s30  }
  0x65 PF: > { %s233_s5 = sand.u32 1, %s473_s6   ;;  %p707_p6 = scmp.ge.s32.totalorder %s493_s11, 2 }
  0x66   : > { %s234_s18 = scalar_lea.sflag [#allocation4], %s233_s5 }
  0x67   : > { %p329_p7 = pnand %p707_p6, %p565_p11 }
  0x69   : > { %p330_p10 = pneg %p329_p7 }
  0x6b   : > { %468 = dma.done.wait (%p330_p10), %s234_s18, 1152  }
  0x6c   : > { %470 = vsyncadd (%p330_p10), %s234_s18, 4294966144  ;;  %s17_s11 = sadd.s32 1, %s493_s11   ;;  %s708_s6 = smov %s477_s7 }
  0x6d   : > { %p14_p13 = scmp.ge.s32.totalorder %s17_s11, 4   ;;  %s709_s7 = smov %s481_s8 }
  0x6e   : > { %s710_s8 = smov %s563_s19  ;;  %s711_s9 = smov %s489_s10 }
  0x6f   : > { %s712_s10 = smov %s714_s14  ;;  %16 = sbr.rel (!%p14_p13) target bundleno = 6 (0x6), region = 69 }
  0x74   :  { %239 = vsyncpa [#allocation3], 1 }
  0x75   :  { %241 = vsyncpa [#allocation3 + $0x1], 1 }
  0x76   :  { %242 = vsyncpa [#allocation4], 1 }
  0x77   :  { %244 = vsyncpa [#allocation4 + $0x1], 1 }

</bundles_post_ra>
